<compile_context>
chip_gen: v6e
topology: v6e:2x2x1
jax: 0.10.0
libtpu: 0.0.40
codegen_flags: <defaults>
</compile_context>

<pallas_src>
import functools

import numpy as np
import jax
import jax.numpy as jnp
from jax.experimental import pallas as pl
from jax.experimental.pallas import tpu as pltpu


def _round_up(n, m):
    return ((n + m - 1) // m) * m


# ----------------------------------------------------------------------------
# Host-side (cached) construction of the bilinear-upsample map.
# ----------------------------------------------------------------------------
def _bilinear_matrix(out_size, in_size):
    """(out_size, in_size) matrix for bilinear interp, align_corners=True."""
    U = np.zeros((out_size, in_size), np.float32)
    if in_size == 1:
        U[:, 0] = 1.0
        return U
    for h in range(out_size):
        pos = h * (in_size - 1) / (out_size - 1) if out_size > 1 else 0.0
        i0 = min(int(np.floor(pos)), in_size - 1)
        frac = pos - i0
        U[h, i0] += 1.0 - frac
        if i0 + 1 < in_size:
            U[h, i0 + 1] += frac
    return U


@functools.lru_cache(maxsize=None)
def _upsample_map_padded(H, W, Wp, Lr, height, width, HWr):
    """(Lr, HWr) bf16 map from the padded-flattened conv grid (row stride Wp)
    to the flattened (height*width) output grid; invalid rows/cols are zero."""
    Uh = _bilinear_matrix(height, H)                      # (height, H)
    Uw = _bilinear_matrix(width, W)                       # (width, W)
    blk = np.einsum("hi,wj->hwij", Uh, Uw).reshape(height * width, H, W)
    tmp = np.zeros((height * width, H, Wp), np.float32)
    tmp[:, :, :W] = blk
    full = np.zeros((Lr, HWr), np.float32)
    full[: H * Wp, : height * width] = tmp.reshape(height * width, H * Wp).T
    return jnp.asarray(full, dtype=jnp.bfloat16)


# ----------------------------------------------------------------------------
# Fused kernel: conv3x3(+folded BN)+ReLU  ->  conv1x1+bias  ->  bilinear up.
# ----------------------------------------------------------------------------
def _aux_psp_kernel(x_ref, w1_ref, b1_ref, wc_ref, b2_ref, up_ref, o_ref,
                    acc_ref, *, tap_offsets, lr):
    # x_ref:   (1, CT, Npad)   bf16  one Cin-tile of one image, padded+flattened
    # w1_ref:  (CT, 9*Cmid)    bf16  folded conv3x3 weights (tap-major lanes)
    # b1_ref:  (Cmid, 1)       f32   folded BN shift
    # wc_ref:  (ncls, Cmid)    bf16  1x1 classification conv weight
    # b2_ref:  (ncls, 1)       f32   classification bias
    # up_ref:  (Lr, HWr)       bf16  bilinear align_corners=True upsample map
    # o_ref:   (1, ncls, HWr)  f32
    # acc_ref: (Cmid, Lr)      f32   conv3x3 accumulator (scratch)
    k = pl.program_id(1)
    nk = pl.num_programs(1)
    cmid = w1_ref.shape[1] // 9

    @pl.when(k == 0)
    def _init():
        acc_ref[...] = jnp.zeros_like(acc_ref)

    xb = x_ref[0]                                         # (CT, Npad) bf16
    w1 = w1_ref[...]                                      # (CT, 9*Cmid) bf16
    acc = acc_ref[...]
    # 3x3 conv = 9 shifted matmuls on the padded-flattened spatial axis.
    for t, off in enumerate(tap_offsets):
        wt = w1[:, t * cmid:(t + 1) * cmid]               # (CT, Cmid)
        xs = xb[:, off:off + lr]                          # (CT, Lr)
        acc = acc + jax.lax.dot_general(
            wt, xs,
            dimension_numbers=(((0,), (0,)), ((), ())),
            preferred_element_type=jnp.float32)           # (Cmid, Lr)
    acc_ref[...] = acc

    @pl.when(k == nk - 1)
    def _finalize():
        # folded BN shift + ReLU (f32 epilogue).
        h = jnp.maximum(acc_ref[...] + b1_ref[...], 0.0)  # (Cmid, Lr)
        # TODO(synk): Dropout(p=0.1) is identity at inference; training-mode
        # RNG masking is not implemented.
        logits = jnp.dot(wc_ref[...], h.astype(jnp.bfloat16),
                         preferred_element_type=jnp.float32) + b2_ref[...]
        out = jnp.dot(logits.astype(jnp.bfloat16), up_ref[...],
                      preferred_element_type=jnp.float32)  # (ncls, HWr)
        o_ref[0] = out.astype(o_ref.dtype)


def aux_psp_forward(x, params, height, width, *, cin_tile=None, eps=1e-5):
    """x: (B, Cin, H, W) f32 NCHW.  Returns (B, n_classes, height, width) f32."""
    w1, gamma, beta, mean, var, wc, bc = params
    B, Cin, H, W = x.shape
    Cmid = w1.shape[0]
    n_classes = wc.shape[0]

    Hp, Wp = H + 2, W + 2
    L = H * Wp                                   # flattened (padded-stride) rows
    Lr = _round_up(L, 128)                       # lane-padded accumulator width
    Npad = _round_up(2 * Wp + 2 + Lr, 128)       # padded-flattened x length
    HW_out = height * width
    HWr = _round_up(HW_out, 128)                 # lane-dense output width

    if cin_tile is None:
        cin_tile = Cin if Cin <= 256 else 256
    assert Cin % cin_tile == 0 and cin_tile % 8 == 0, (Cin, cin_tile)
    kcount = Cin // cin_tile

    # ---- fold BN into the 3x3 conv (host-side prep; cacheable per module) ----
    scale = gamma / jnp.sqrt(var + eps)
    shift = beta - mean * scale
    w1f = w1 * scale[:, None, None, None]                         # (Cmid,Cin,3,3)
    w1r = jnp.transpose(w1f, (1, 2, 3, 0)).reshape(Cin, 9 * Cmid)  # (Cin, 9*Cmid)
    w1r = w1r.astype(jnp.bfloat16)
    b1 = shift.reshape(Cmid, 1).astype(jnp.float32)
    wc2 = wc.reshape(n_classes, Cmid).astype(jnp.bfloat16)
    b2 = bc.reshape(n_classes, 1).astype(jnp.float32)

    # ---- zero-pad + flatten x (spatial pad=1 for the 3x3 conv) ----
    xp = jnp.pad(x, ((0, 0), (0, 0), (1, 1), (1, 1)))              # (B,Cin,Hp,Wp)
    xp = xp.reshape(B, Cin, Hp * Wp)
    xp = jnp.pad(xp, ((0, 0), (0, 0), (0, Npad - Hp * Wp)))
    xp = xp.astype(jnp.bfloat16)

    upT = _upsample_map_padded(H, W, Wp, Lr, height, width, HWr)   # (Lr, HWr)
    tap_offsets = tuple(dy * Wp + dx for dy in range(3) for dx in range(3))

    kernel = functools.partial(_aux_psp_kernel, tap_offsets=tap_offsets, lr=Lr)

    out = pl.pallas_call(
        kernel,
        out_shape=jax.ShapeDtypeStruct((B, n_classes, HWr), jnp.float32),
        grid_spec=pltpu.PrefetchScalarGridSpec(
            num_scalar_prefetch=0,
            grid=(B, kcount),
            in_specs=[
                pl.BlockSpec((1, cin_tile, Npad), lambda b, k: (b, k, 0)),
                pl.BlockSpec((cin_tile, 9 * Cmid), lambda b, k: (k, 0)),
                pl.BlockSpec((Cmid, 1), lambda b, k: (0, 0)),
                pl.BlockSpec((n_classes, Cmid), lambda b, k: (0, 0)),
                pl.BlockSpec((n_classes, 1), lambda b, k: (0, 0)),
                pl.BlockSpec((Lr, HWr), lambda b, k: (0, 0)),
            ],
            out_specs=pl.BlockSpec((1, n_classes, HWr), lambda b, k: (b, 0, 0)),
            scratch_shapes=[pltpu.VMEM((Cmid, Lr), jnp.float32)],
        ),
        compiler_params=pltpu.CompilerParams(
            dimension_semantics=("parallel", "arbitrary"),
            vmem_limit_bytes=64 * 1024 * 1024),
    )(xp, w1r, b1, wc2, b2, upT)

    out = out[:, :, :HW_out].reshape(B, n_classes, height, width)
    return out


# ----------------------------------------------------------------------------
# Independent pure-JAX reference (standard conv + gather-lerp bilinear).
# Operands are quantized to bf16 exactly where the kernel quantizes them, so
# the comparison isolates kernel correctness rather than bf16 rounding.
# ----------------------------------------------------------------------------
def aux_psp_reference(x, params, height, width, eps=1e-5):
    w1, gamma, beta, mean, var, wc, bc = params
    Cmid = w1.shape[0]
    n_classes = wc.shape[0]

    scale = gamma / jnp.sqrt(var + eps)
    shift = beta - mean * scale
    w1f = (w1 * scale[:, None, None, None]).astype(jnp.bfloat16).astype(jnp.float32)
    xb = x.astype(jnp.bfloat16).astype(jnp.float32)

    y = jax.lax.conv_general_dilated(
        xb, w1f, window_strides=(1, 1), padding=((1, 1), (1, 1)),
        dimension_numbers=("NCHW", "OIHW", "NCHW"))
    h = jnp.maximum(y + shift[None, :, None, None], 0.0)
    # dropout(p=0.1) is identity in eval mode.
    h16 = h.astype(jnp.bfloat16).astype(jnp.float32)
    wc16 = wc.reshape(n_classes, Cmid).astype(jnp.bfloat16).astype(jnp.float32)
    logits = jnp.einsum("oc,bchw->bohw", wc16, h16) + bc[None, :, None, None]

    lg = logits.astype(jnp.bfloat16).astype(jnp.float32)
    B, C, H, W = lg.shape
    hs = jnp.linspace(0.0, H - 1.0, height)          # align_corners=True coords
    ws = jnp.linspace(0.0, W - 1.0, width)
    h0 = jnp.clip(jnp.floor(hs).astype(jnp.int32), 0, H - 1)
    h1 = jnp.minimum(h0 + 1, H - 1)
    fh = hs - h0.astype(jnp.float32)
    w0 = jnp.clip(jnp.floor(ws).astype(jnp.int32), 0, W - 1)
    w1i = jnp.minimum(w0 + 1, W - 1)
    fw = ws - w0.astype(jnp.float32)
    top = (lg[:, :, h0, :] * (1.0 - fh)[None, None, :, None]
           + lg[:, :, h1, :] * fh[None, None, :, None])
    out = (top[:, :, :, w0] * (1.0 - fw)[None, None, None, :]
           + top[:, :, :, w1i] * fw[None, None, None, :])
    return out


if __name__ == "__main__":
    # Small shapes consistent with the module (real: Cin=1024, Cmid=256).
    B, Cin, H, W = 2, 32, 8, 8
    Cmid, n_classes = 16, 8
    height, width = 16, 16
    eps = 1e-5

    key = jax.random.PRNGKey(0)
    ks = jax.random.split(key, 8)
    x = jax.random.normal(ks[0], (B, Cin, H, W), jnp.float32)
    w1 = 0.1 * jax.random.normal(ks[1], (Cmid, Cin, 3, 3), jnp.float32)   # conv3x3, bias=False
    gamma = 1.0 + 0.1 * jax.random.normal(ks[2], (Cmid,), jnp.float32)    # BN weight
    beta = 0.1 * jax.random.normal(ks[3], (Cmid,), jnp.float32)           # BN bias
    mean = 0.1 * jax.random.normal(ks[4], (Cmid,), jnp.float32)           # BN running_mean
    var = jnp.abs(jax.random.normal(ks[5], (Cmid,), jnp.float32)) + 0.5   # BN running_var
    wc = 0.1 * jax.random.normal(ks[6], (n_classes, Cmid, 1, 1), jnp.float32)  # conv1x1
    bc = 0.1 * jax.random.normal(ks[7], (n_classes,), jnp.float32)             # conv1x1 bias
    params = (w1, gamma, beta, mean, var, wc, bc)

    out = aux_psp_forward(x, params, height, width, cin_tile=16, eps=eps)
    out = jax.block_until_ready(out)
    assert out.shape == (B, n_classes, height, width), out.shape

    ref = aux_psp_reference(x, params, height, width, eps=eps)
    np.testing.assert_allclose(np.asarray(out), np.asarray(ref),
                               rtol=1e-2, atol=1e-2)

    print("KERNEL_OK")
</pallas_src>

<mosaic_0001>
module attributes {stable_mosaic.version = 11 : i64} {
  func.func @_aux_psp_kernel(%arg0: i32, %arg1: i32, %arg2: memref<1x16x256xbf16, #tpu.memory_space<vmem>>, %arg3: memref<16x144xbf16, #tpu.memory_space<vmem>>, %arg4: memref<16x1xf32, #tpu.memory_space<vmem>>, %arg5: memref<8x16xbf16, #tpu.memory_space<vmem>>, %arg6: memref<8x1xf32, #tpu.memory_space<vmem>>, %arg7: memref<128x256xbf16, #tpu.memory_space<vmem>>, %arg8: memref<1x8x256xf32, #tpu.memory_space<vmem>>, %arg9: memref<16x128xf32, #tpu.memory_space<vmem>>) attributes {dimension_semantics = [#tpu.dimension_semantics<parallel>, #tpu.dimension_semantics<arbitrary>], iteration_bounds = array<i64: 2, 2>, scalar_prefetch = 0 : i64, scratch_operands = 1 : i64, tpu.core_type = #tpu.core_type<tc>, window_params = [{transform_indices = @transform_0, window_bounds = array<i64: 1, 16, 256>}, {transform_indices = @transform_1, window_bounds = array<i64: 16, 144>}, {pipeline_mode = #tpu.pipeline_mode<synchronous>, transform_indices = @transform_2, window_bounds = array<i64: 16, 1>}, {pipeline_mode = #tpu.pipeline_mode<synchronous>, transform_indices = @transform_3, window_bounds = array<i64: 8, 16>}, {pipeline_mode = #tpu.pipeline_mode<synchronous>, transform_indices = @transform_4, window_bounds = array<i64: 8, 1>}, {pipeline_mode = #tpu.pipeline_mode<synchronous>, transform_indices = @transform_5, window_bounds = array<i64: 128, 256>}, {transform_indices = @transform_6, window_bounds = array<i64: 1, 8, 256>}]} {
    %c0_i32 = arith.constant 0 : i32
    %0 = arith.cmpi eq, %arg1, %c0_i32 : i32
    %1 = arith.extui %0 : i1 to i32
    %c0_i32_0 = arith.constant 0 : i32
    %2 = arith.cmpi ne, %1, %c0_i32_0 : i32
    scf.if %2 {
      %cst_18 = arith.constant 0.000000e+00 : f32
      %47 = vector.broadcast %cst_18 : f32 to vector<16x128xf32>
      %c0_19 = arith.constant 0 : index
      %c0_20 = arith.constant 0 : index
      %48 = vector.load %arg9[%c0_19, %c0_20] : memref<16x128xf32, #tpu.memory_space<vmem>>, vector<16x128xf32>
      tpu.vector_store %arg9[%c0_19, %c0_20], %47 {strides = array<i32>} : memref<16x128xf32, #tpu.memory_space<vmem>>, vector<16x128xf32>,
    } else {
    }
    %c0 = arith.constant 0 : index
    %c0_1 = arith.constant 0 : index
    %c0_2 = arith.constant 0 : index
    %3 = vector.load %arg2[%c0, %c0_1, %c0_2] : memref<1x16x256xbf16, #tpu.memory_space<vmem>>, vector<1x16x256xbf16>
    %4 = vector.shape_cast %3 : vector<1x16x256xbf16> to vector<16x256xbf16>
    %c0_3 = arith.constant 0 : index
    %c0_4 = arith.constant 0 : index
    %5 = vector.load %arg3[%c0_3, %c0_4] : memref<16x144xbf16, #tpu.memory_space<vmem>>, vector<16x144xbf16>
    %c0_5 = arith.constant 0 : index
    %c0_6 = arith.constant 0 : index
    %6 = vector.load %arg9[%c0_5, %c0_6] : memref<16x128xf32, #tpu.memory_space<vmem>>, vector<16x128xf32>
    %7 = vector.extract_strided_slice %5 {offsets = [0, 0], sizes = [16, 16], strides = [1, 1]} : vector<16x144xbf16> to vector<16x16xbf16>
    %8 = vector.extract_strided_slice %4 {offsets = [0, 0], sizes = [16, 128], strides = [1, 1]} : vector<16x256xbf16> to vector<16x128xbf16>
    %cst = arith.constant dense<0.000000e+00> : vector<16x128xf32>
    %9 = tpu.matmul %7, %8, %cst {dimension_numbers = #tpu.dot_dimension_numbers<[0], [0], [1], [1], [0, 1, 1, 1], [], []>} : vector<16x16xbf16>, vector<16x128xbf16>, vector<16x128xf32> -> vector<16x128xf32>
    %10 = arith.addf %6, %9 : vector<16x128xf32>
    %11 = vector.extract_strided_slice %5 {offsets = [0, 16], sizes = [16, 16], strides = [1, 1]} : vector<16x144xbf16> to vector<16x16xbf16>
    %12 = vector.extract_strided_slice %4 {offsets = [0, 1], sizes = [16, 128], strides = [1, 1]} : vector<16x256xbf16> to vector<16x128xbf16>
    %cst_7 = arith.constant dense<0.000000e+00> : vector<16x128xf32>
    %13 = tpu.matmul %11, %12, %cst_7 {dimension_numbers = #tpu.dot_dimension_numbers<[0], [0], [1], [1], [0, 1, 1, 1], [], []>} : vector<16x16xbf16>, vector<16x128xbf16>, vector<16x128xf32> -> vector<16x128xf32>
    %14 = arith.addf %10, %13 : vector<16x128xf32>
    %15 = vector.extract_strided_slice %5 {offsets = [0, 32], sizes = [16, 16], strides = [1, 1]} : vector<16x144xbf16> to vector<16x16xbf16>
    %16 = vector.extract_strided_slice %4 {offsets = [0, 2], sizes = [16, 128], strides = [1, 1]} : vector<16x256xbf16> to vector<16x128xbf16>
    %cst_8 = arith.constant dense<0.000000e+00> : vector<16x128xf32>
    %17 = tpu.matmul %15, %16, %cst_8 {dimension_numbers = #tpu.dot_dimension_numbers<[0], [0], [1], [1], [0, 1, 1, 1], [], []>} : vector<16x16xbf16>, vector<16x128xbf16>, vector<16x128xf32> -> vector<16x128xf32>
    %18 = arith.addf %14, %17 : vector<16x128xf32>
    %19 = vector.extract_strided_slice %5 {offsets = [0, 48], sizes = [16, 16], strides = [1, 1]} : vector<16x144xbf16> to vector<16x16xbf16>
    %20 = vector.extract_strided_slice %4 {offsets = [0, 10], sizes = [16, 128], strides = [1, 1]} : vector<16x256xbf16> to vector<16x128xbf16>
    %cst_9 = arith.constant dense<0.000000e+00> : vector<16x128xf32>
    %21 = tpu.matmul %19, %20, %cst_9 {dimension_numbers = #tpu.dot_dimension_numbers<[0], [0], [1], [1], [0, 1, 1, 1], [], []>} : vector<16x16xbf16>, vector<16x128xbf16>, vector<16x128xf32> -> vector<16x128xf32>
    %22 = arith.addf %18, %21 : vector<16x128xf32>
    %23 = vector.extract_strided_slice %5 {offsets = [0, 64], sizes = [16, 16], strides = [1, 1]} : vector<16x144xbf16> to vector<16x16xbf16>
    %24 = vector.extract_strided_slice %4 {offsets = [0, 11], sizes = [16, 128], strides = [1, 1]} : vector<16x256xbf16> to vector<16x128xbf16>
    %cst_10 = arith.constant dense<0.000000e+00> : vector<16x128xf32>
    %25 = tpu.matmul %23, %24, %cst_10 {dimension_numbers = #tpu.dot_dimension_numbers<[0], [0], [1], [1], [0, 1, 1, 1], [], []>} : vector<16x16xbf16>, vector<16x128xbf16>, vector<16x128xf32> -> vector<16x128xf32>
    %26 = arith.addf %22, %25 : vector<16x128xf32>
    %27 = vector.extract_strided_slice %5 {offsets = [0, 80], sizes = [16, 16], strides = [1, 1]} : vector<16x144xbf16> to vector<16x16xbf16>
    %28 = vector.extract_strided_slice %4 {offsets = [0, 12], sizes = [16, 128], strides = [1, 1]} : vector<16x256xbf16> to vector<16x128xbf16>
    %cst_11 = arith.constant dense<0.000000e+00> : vector<16x128xf32>
    %29 = tpu.matmul %27, %28, %cst_11 {dimension_numbers = #tpu.dot_dimension_numbers<[0], [0], [1], [1], [0, 1, 1, 1], [], []>} : vector<16x16xbf16>, vector<16x128xbf16>, vector<16x128xf32> -> vector<16x128xf32>
    %30 = arith.addf %26, %29 : vector<16x128xf32>
    %31 = vector.extract_strided_slice %5 {offsets = [0, 96], sizes = [16, 16], strides = [1, 1]} : vector<16x144xbf16> to vector<16x16xbf16>
    %32 = vector.extract_strided_slice %4 {offsets = [0, 20], sizes = [16, 128], strides = [1, 1]} : vector<16x256xbf16> to vector<16x128xbf16>
    %cst_12 = arith.constant dense<0.000000e+00> : vector<16x128xf32>
    %33 = tpu.matmul %31, %32, %cst_12 {dimension_numbers = #tpu.dot_dimension_numbers<[0], [0], [1], [1], [0, 1, 1, 1], [], []>} : vector<16x16xbf16>, vector<16x128xbf16>, vector<16x128xf32> -> vector<16x128xf32>
    %34 = arith.addf %30, %33 : vector<16x128xf32>
    %35 = vector.extract_strided_slice %5 {offsets = [0, 112], sizes = [16, 16], strides = [1, 1]} : vector<16x144xbf16> to vector<16x16xbf16>
    %36 = vector.extract_strided_slice %4 {offsets = [0, 21], sizes = [16, 128], strides = [1, 1]} : vector<16x256xbf16> to vector<16x128xbf16>
    %cst_13 = arith.constant dense<0.000000e+00> : vector<16x128xf32>
    %37 = tpu.matmul %35, %36, %cst_13 {dimension_numbers = #tpu.dot_dimension_numbers<[0], [0], [1], [1], [0, 1, 1, 1], [], []>} : vector<16x16xbf16>, vector<16x128xbf16>, vector<16x128xf32> -> vector<16x128xf32>
    %38 = arith.addf %34, %37 : vector<16x128xf32>
    %39 = vector.extract_strided_slice %5 {offsets = [0, 128], sizes = [16, 16], strides = [1, 1]} : vector<16x144xbf16> to vector<16x16xbf16>
    %40 = vector.extract_strided_slice %4 {offsets = [0, 22], sizes = [16, 128], strides = [1, 1]} : vector<16x256xbf16> to vector<16x128xbf16>
    %cst_14 = arith.constant dense<0.000000e+00> : vector<16x128xf32>
    %41 = tpu.matmul %39, %40, %cst_14 {dimension_numbers = #tpu.dot_dimension_numbers<[0], [0], [1], [1], [0, 1, 1, 1], [], []>} : vector<16x16xbf16>, vector<16x128xbf16>, vector<16x128xf32> -> vector<16x128xf32>
    %42 = arith.addf %38, %41 : vector<16x128xf32>
    %c0_15 = arith.constant 0 : index
    %c0_16 = arith.constant 0 : index
    %43 = vector.load %arg9[%c0_15, %c0_16] : memref<16x128xf32, #tpu.memory_space<vmem>>, vector<16x128xf32>
    tpu.vector_store %arg9[%c0_15, %c0_16], %42 {strides = array<i32>} : memref<16x128xf32, #tpu.memory_space<vmem>>, vector<16x128xf32>,
    %c1_i32 = arith.constant 1 : i32
    %44 = arith.cmpi eq, %arg1, %c1_i32 : i32
    %45 = arith.extui %44 : i1 to i32
    %c0_i32_17 = arith.constant 0 : i32
    %46 = arith.cmpi ne, %45, %c0_i32_17 : i32
    scf.if %46 {
      %c0_18 = arith.constant 0 : index
      %c0_19 = arith.constant 0 : index
      %47 = vector.load %arg9[%c0_18, %c0_19] : memref<16x128xf32, #tpu.memory_space<vmem>>, vector<16x128xf32>
      %c0_20 = arith.constant 0 : index
      %c0_21 = arith.constant 0 : index
      %48 = vector.load %arg4[%c0_20, %c0_21] : memref<16x1xf32, #tpu.memory_space<vmem>>, vector<16x1xf32>
      %49 = vector.broadcast %48 : vector<16x1xf32> to vector<16x128xf32>
      %50 = arith.addf %47, %49 : vector<16x128xf32>
      %cst_22 = arith.constant 0.000000e+00 : f32
      %51 = vector.broadcast %cst_22 : f32 to vector<16x128xf32>
      %52 = arith.maximumf %50, %51 : vector<16x128xf32>
      %c0_23 = arith.constant 0 : index
      %c0_24 = arith.constant 0 : index
      %53 = vector.load %arg5[%c0_23, %c0_24] : memref<8x16xbf16, #tpu.memory_space<vmem>>, vector<8x16xbf16>
      %54 = arith.truncf %52 : vector<16x128xf32> to vector<16x128xbf16>
      %cst_25 = arith.constant dense<0.000000e+00> : vector<8x128xf32>
      %55 = tpu.matmul %53, %54, %cst_25 {dimension_numbers = #tpu.dot_dimension_numbers<[1], [0], [0], [1], [0, 0, 1, 1], [], []>} : vector<8x16xbf16>, vector<16x128xbf16>, vector<8x128xf32> -> vector<8x128xf32>
      %c0_26 = arith.constant 0 : index
      %c0_27 = arith.constant 0 : index
      %56 = vector.load %arg6[%c0_26, %c0_27] : memref<8x1xf32, #tpu.memory_space<vmem>>, vector<8x1xf32>
      %57 = vector.broadcast %56 : vector<8x1xf32> to vector<8x128xf32>
      %58 = arith.addf %55, %57 : vector<8x128xf32>
      %59 = arith.truncf %58 : vector<8x128xf32> to vector<8x128xbf16>
      %c0_28 = arith.constant 0 : index
      %c0_29 = arith.constant 0 : index
      %60 = vector.load %arg7[%c0_28, %c0_29] : memref<128x256xbf16, #tpu.memory_space<vmem>>, vector<128x256xbf16>
      %cst_30 = arith.constant dense<0.000000e+00> : vector<8x256xf32>
      %61 = tpu.matmul %59, %60, %cst_30 {dimension_numbers = #tpu.dot_dimension_numbers<[1], [0], [0], [1], [0, 0, 1, 1], [], []>} : vector<8x128xbf16>, vector<128x256xbf16>, vector<8x256xf32> -> vector<8x256xf32>
      %c0_31 = arith.constant 0 : index
      %c0_32 = arith.constant 0 : index
      %c0_33 = arith.constant 0 : index
      %62 = vector.load %arg8[%c0_31, %c0_32, %c0_33] : memref<1x8x256xf32, #tpu.memory_space<vmem>>, vector<1x8x256xf32>
      %63 = vector.shape_cast %62 : vector<1x8x256xf32> to vector<8x256xf32>
      %64 = vector.shape_cast %61 : vector<8x256xf32> to vector<1x8x256xf32>
      tpu.vector_store %arg8[%c0_31, %c0_32, %c0_33], %64 {strides = array<i32>} : memref<1x8x256xf32, #tpu.memory_space<vmem>>, vector<1x8x256xf32>,
    } else {
    }
    return
  }
  func.func @transform_0(%arg0: i32, %arg1: i32) -> (i32, i32, i32) {
    %c0_i32 = arith.constant 0 : i32
    %c0_i32_0 = arith.constant 0 : i32
    return %arg0, %arg1, %c0_i32 : i32, i32, i32
  }
  func.func @transform_1(%arg0: i32, %arg1: i32) -> (i32, i32) {
    %c0_i32 = arith.constant 0 : i32
    %c0_i32_0 = arith.constant 0 : i32
    return %arg1, %c0_i32 : i32, i32
  }
  func.func @transform_2(%arg0: i32, %arg1: i32) -> (i32, i32) {
    %c0_i32 = arith.constant 0 : i32
    %c0_i32_0 = arith.constant 0 : i32
    %c0_i32_1 = arith.constant 0 : i32
    return %c0_i32, %c0_i32_0 : i32, i32
  }
  func.func @transform_3(%arg0: i32, %arg1: i32) -> (i32, i32) {
    %c0_i32 = arith.constant 0 : i32
    %c0_i32_0 = arith.constant 0 : i32
    %c0_i32_1 = arith.constant 0 : i32
    return %c0_i32, %c0_i32_0 : i32, i32
  }
  func.func @transform_4(%arg0: i32, %arg1: i32) -> (i32, i32) {
    %c0_i32 = arith.constant 0 : i32
    %c0_i32_0 = arith.constant 0 : i32
    %c0_i32_1 = arith.constant 0 : i32
    return %c0_i32, %c0_i32_0 : i32, i32
  }
  func.func @transform_5(%arg0: i32, %arg1: i32) -> (i32, i32) {
    %c0_i32 = arith.constant 0 : i32
    %c0_i32_0 = arith.constant 0 : i32
    %c0_i32_1 = arith.constant 0 : i32
    return %c0_i32, %c0_i32_0 : i32, i32
  }
  func.func @transform_6(%arg0: i32, %arg1: i32) -> (i32, i32, i32) {
    %c0_i32 = arith.constant 0 : i32
    %c0_i32_0 = arith.constant 0 : i32
    %c0_i32_1 = arith.constant 0 : i32
    return %arg0, %c0_i32, %c0_i32_0 : i32, i32, i32
  }
}

</mosaic_0001>

<bundles_post_ra>
// kernel: tpu_custom_call.1
= control target key start
LH: loop header
LB: loop body
LE: loop exit
PB: predicated region body
PF: predicated region fallthrough
CT: control target
= control target key end

     0   :  { %s2353_s0 = inlined_call_operand.hbm [shape: bf16[2,32,256], index: 0, kind: input, shape index: {}]   ;;  %s2354_s1 = inlined_call_operand.hbm [shape: bf16[32,144], index: 1, kind: input, shape index: {}]   ;;  %s2355_s2 = inlined_call_operand.vmem [shape: f32[16,1], index: 2, kind: input, shape index: {}]   ;;  %s2356_s3 = inlined_call_operand.vmem [shape: bf16[8,16], index: 3, kind: input, shape index: {}]   ;;  %s2357_s4 = inlined_call_operand.vmem [shape: f32[8,1], index: 4, kind: input, shape index: {}]   ;;  %s2358_s5 = inlined_call_operand.hbm [shape: bf16[128,256], index: 5, kind: input, shape index: {}]   ;;  %s2359_s6 = inlined_call_operand.hbm [shape: f32[2,8,256], index: 6, kind: output, shape index: {}]  }
   0x1   :  { %2382 = sst [smem:[#allocation24_spill]] %s2353_s0 }
   0x2   :  { %2383 = sst [smem:[#allocation25_spill]] %s2355_s2 }
   0x3   :  { %2384 = sst [smem:[#allocation26_spill]] %s2356_s3 }
   0x4   :  { %2385 = sst [smem:[#allocation27_spill]] %s2357_s4 }
   0x5   :  { %2386 = sst [smem:[#allocation28_spill]] %s2358_s5 }
   0x6   :  { %2387 = sst [smem:[#allocation29_spill]] %s2359_s6 }
   0x7   :  { %11 = vsyncpa [#allocation4], 0 }
   0x8   :  { %13 = vsyncpa [#allocation4 + $0x1], 0 }
   0x9   :  { %14 = vsyncpa [#allocation7], 0 }
   0xa   :  { %16 = vsyncpa [#allocation7 + $0x1], 0 }
   0xb   :  { %17 = vsyncpa [#allocation5], 0 }
   0xc   :  { %19 = vsyncpa [#allocation5 + $0x1], 0  ;;  %s1994_s21 = smov 0   ;;  %s1996_s22 = smov 0  }
   0xd   :  { %s1998_s23 = smov 0   ;;  %s2000_s24 = smov 0  }
   0xe   :  { %s2002_s25 = smov 0   ;;  %s2004_s26 = smov 0  }
   0xf   :  { %s2006_s27 = smov 0   ;;  %s2008_s28 = smov 0  }
  0x10   :  { %s2010_s29 = smov 0   ;;  %s2012_s30 = smov 0  }
  0x11   :  { %s2014_s7 = smov 0   ;;  %s2016_s8 = smov 0  }
  0x12   :  { %s2018_s9 = smov 0   ;;  %s2020_s10 = smov 0  }
  0x13 LB: > { %2388 = sst [smem:[#allocation14_spill]] %s1878_s21  ;;  %s2061_s11 = sadd.s32 4294967295, %s1930_s10   ;;  %s1930_s10 = sphi %s2020_s10, %s25_s10   ;;  %s1926_s9 = sphi %s2018_s9, %s2446_s9   ;;  %s1922_s8 = sphi %s2016_s8, %s2445_s8   ;;  %s1918_s7 = sphi %s2014_s7, %s2444_s7   ;;  %s1914_s30 = sphi %s2012_s30, %s2443_s30   ;;  %s1910_s29 = sphi %s2010_s29, %s2442_s29   ;;  %s1906_s28 = sphi %s2008_s28, %s2441_s28   ;;  %s1902_s27 = sphi %s2006_s27, %s2440_s27   ;;  %s1898_s26 = sphi %s2004_s26, %s2439_s26   ;;  %s1894_s25 = sphi %s2002_s25, %s2438_s25   ;;  %s1890_s24 = sphi %s2000_s24, %s2437_s24   ;;  %s1886_s23 = sphi %s1998_s23, %s2436_s23   ;;  %s1882_s22 = sphi %s1996_s22, %s2435_s22   ;;  %s1878_s21 = sphi %s1994_s21, %s2433_s21  }
  0x14   : > { %2389 = sst [smem:[#allocation15_spill]] %s1882_s22  ;;  %s1359_s12 = sadd.s32 4294967294, %s1930_s10  }
  0x15   : > { %2390 = sst [smem:[#allocation16_spill]] %s1914_s30  ;;  %p59_p0 = scmp.ne.s32.totalorder %s1906_s28, %s1902_s27 }
  0x16   : > { %2391 = sst [smem:[#allocation17_spill]] %s1918_s7  ;;  %p2381_p1 = scmp.eq.s32.totalorder %s2061_s11, 0 }
  0x17   : > { %2392 = sst [smem:[#allocation18_spill]] %s2061_s11  ;;  %p85_p2 = scmp.ne.s32.totalorder %s1894_s25, %s1890_s24 }
  0x18   : > { %p2070_p3 = por %p2381_p1, %p59_p0  ;;  %p192_p4 = scmp.ne.s32.totalorder %s1886_s23, %s1882_s22 }
  0x19   : > { %p2078_p5 = por %p85_p2, %p2381_p1  ;;  %p193_p6 = scmp.eq.s32.totalorder %s2061_s11, 3 }
  0x1a   : > { %s2393_s14 = scalar_select %p2070_p3, 1, 0 }
  0x1b   : > { %s2395_s15 = scalar_select %p2078_p5, 1, 0 }
  0x1c   : > { %2394 = sst [smem:[#allocation19_spill]] %s2393_s14  ;;  %p198_p7 = scmp.ne.s32.totalorder %s1882_s22, %s1878_s21 }
  0x1d   : > { %2396 = sst [smem:[#allocation20_spill]] %s2395_s15  ;;  %p199_p8 = scmp.eq.s32.totalorder %s1359_s12, 3 }
  0x1e   : > { %p2085_p9 = por %p193_p6, %p192_p4  ;;  %p1360_p10 = scmp.ge.s32.totalorder %s1930_s10, 1 }
  0x1f   : > { %p2090_p11 = por %p199_p8, %p198_p7  ;;  %p206_p12 = scmp.lt.s32.totalorder %s1930_s10, 5 }
  0x20   : > { %s2397_s16 = scalar_select %p2085_p9, 1, 0 }
  0x21   : > { %s2399_s17 = scalar_select %p2090_p11, 1, 0 }
  0x22   : > { %2398 = sst [smem:[#allocation21_spill]] %s2397_s16  ;;  %p2095_p13 = pnand %p1360_p10, %p206_p12 }
  0x23   : > { %2400 = sst [smem:[#allocation22_spill]] %s2399_s17  ;;  %s1932_s19 = smov [#allocation8]  }
  0x24   : > { %s227_s20 = sshll.u32 %s1932_s19, 4  ;;  %p1508_p0 = pneg %p2095_p13  ;;  %s228_s20 = int_to_ptr.vmem [resolvable:$true] %s227_s20 }
  0x25   : > { %s1707_s24 = scalar_lea.vmem %s228_s20, 2048  ;;  %p1715_p9 = scmp.lt.s32.totalorder %s228_s20, %s228_s20 }
  0x26   : > { %p1509_p2 = pnand %p1508_p0, %p2381_p1  ;;  %p1708_p6 = scmp.ne.s32.totalorder %s228_s20, %s1707_s24 }
  0x27   : > { %p1716_p11 = scmp.lt.s32.totalorder %s1707_s24, %s1707_s24 }
  0x28   : > { %p1698_p4 = pneg %p1509_p2 }
  0x29   : > { %p1717_p5 = por %p1716_p11, %p1715_p9 }
  0x2a   : > { %p1710_p7 = pnand %p1708_p6, %p1698_p4 }
  0x2c   : > { %p1711_p8 = pneg %p1710_p7 }
  0x2e   : > { %p1718_p10 = pnand %p1717_p5, %p1711_p8 }
  0x30   : > { %1721 = shalt.err (!%p1718_p10)
}
  0x31   : > { %s2365_s27 = smov 128   ;;  %s2367_s12 = smov 8  }
  0x32   : > { %s2402_s5 = sld [smem:[#allocation28_spill]]  ;;  %s34_s13 = sadd.s32 1, %s1922_s8 }
  0x33   : > { %p35_p5 = scmp.ge.s32.totalorder %s34_s13, 2  ;;  %s37_s17 = sadd.s32 1, %s1926_s9 }
  0x34   : > { %s46_s21 = sadd.s32 1, %s1910_s29  ;;  %p53_p9 = scmp.ne.s32.totalorder %s1910_s29, %s1906_s28 }
  0x35   : > { %s2448_s13 = smov (%p35_p5, %s34_s13), 0  ;;  %s2450_s17 = smov (!%p35_p5, %s37_s17), %s1926_s9 }
  0x36   : > { %2403 = sst [smem:[#allocation23_spill]] %s2448_s13  ;;  %s2119_s6 = ssub.s32 %s1922_s8, %s2448_s13 }
  0x37   : > { %p54_p11 = scmp.eq.s32.totalorder %s1930_s10, 0  ;;  %p39_p12 = scmp.ge.s32.totalorder %s2450_s17, 2 }
  0x38   : > { %1511 = dma.hbm_to_vmem [thread:$0]  (!%p1509_p2), %s2402_s5, 2048, %s228_s20, [#allocation7], %s2365_s27, %s2365_s27, %s2367_s12  }
  0x39   : > { %p70_p0 = scmp.eq.s32.totalorder %s2119_s6, 0  ;;  %p2125_p2 = por %p54_p11, %p53_p9 }
  0x3a   : > { %p1524_p4 = scmp.lt.s32.totalorder %s1930_s10, 4  ;;  %s2452_s17 = smov (%p39_p12, %s2450_s17), 0 }
  0x3b   : > { %s241_s19 = sand.u32 1, %s1910_s29   ;;  %s1414_s24 = sshll.u32 %s1922_s8, 2 }
  0x3c   : > { %s41_s27 = ssub.s32 %s1926_s9, %s2452_s17  ;;  %s1363_s5 = sshll.u32 %s241_s19, 4 }
  0x3d   : > { %s43_s12 = sor.u32 %s2119_s6, %s41_s27  ;;  %p180_p6 = scmp.eq.s32.totalorder %s41_s27, 0 }
  0x3e   : > { %p44_p7 = scmp.eq.s32.totalorder %s43_s12, 0  ;;  %s2405_s13 = sadd.s32 1, %s1886_s23 }
  0x3f   : > { %s2140_s16 = scalar_select %p180_p6, %s1886_s23, %s2405_s13  }
  0x40   : > { %s2143_s7 = scalar_select %p44_p7, %s1910_s29, %s46_s21  }
  0x41   : > { %s1366_s3 = sshll.u32 %s1926_s9, 3  ;;  %s245_s2 = scalar_lea.vmem [#allocation3], %s1363_s5 }
  0x42   : > { %s252_s4 = sadd.s32 %s1414_s24, %s1366_s3  ;;  %s255_s30 = sshll.u32 %s245_s2, 4  ;;  %s256_s30 = int_to_ptr.vmem [resolvable:$true] %s255_s30 }
  0x43   : > { %s1367_s22 = sshll.u32 %s252_s4, 6  ;;  %s2406_s0 = sld [smem:[#allocation24_spill]] }
  0x44   : > { %p2153_p8 = pnand %p1524_p4, %p2125_p2  ;;  %s265_s13 = sand.u32 1, %s1930_s10  }
  0x45   : > { %s242_s21 = scalar_lea.sflag [#allocation4], %s241_s19  ;;  %s1735_s3 = scalar_lea.vmem %s256_s30, 256 }
  0x46   : > { %p1724_p10 = pneg %p2153_p8  ;;  %p1736_p5 = scmp.ne.s32.totalorder %s256_s30, %s1735_s3 }
  0x47   : > { %s1935_s2 = smov [#allocation3]  }
  0x48   : > { %p1738_p9 = pnand %p1736_p5, %p1724_p10  ;;  %s1740_s4 = sshll.u32 %s1935_s2, 4  ;;  %s1741_s4 = int_to_ptr.vmem [resolvable:$false] %s1740_s4 }
  0x49   : > { %s254_s14 = scalar_lea.hbm %s2406_s0, %s1367_s22  ;;  %s1742_s5 = scalar_lea.vmem %s1741_s4, 512 }
  0x4a   : > { %p1739_p12 = pneg %p1738_p9  ;;  %p1743_p6 = scmp.lt.s32.totalorder %s256_s30, %s1741_s4 }
  0x4b   : > { %p1744_p7 = scmp.lt.s32.totalorder %s1742_s5, %s1735_s3 }
  0x4d   : > { %p1745_p1 = por %p1744_p7, %p1743_p6 }
  0x4f   : > { %p1746_p2 = pnand %p1745_p1, %p1739_p12 }
  0x51   : > { %1749 = shalt.err (!%p1746_p2)
}
  0x52   : > { %s2408_s22 = smov 8   ;;  %s2409_s11 = smov 128  }
  0x53   : > { %1515 = dma.hbm_to_vmem [thread:$0]  (!%p2153_p8), %s254_s14, 256, %s256_s30, %s242_s21, %s2409_s11, %s2409_s11, %s2408_s22  }
  0x54   : > { %s72_s15 = sadd.s32 1, %s1898_s26  ;;  %p79_p10 = scmp.ne.s32.totalorder %s1898_s26, %s1894_s25 }
  0x55   : > { %s2171_s12 = scalar_select %p70_p0, %s1898_s26, %s72_s15  }
  0x56   : > { %p81_p1 = por %p79_p10, %p54_p11  ;;  %s267_s20 = sand.u32 1, %s1898_s26  }
  0x57   : > { %s1416_s19 = sshll.u32 %s1922_s8, 8  ;;  %s1368_s24 = sshll.u32 %s267_s20, 4 }
  0x58   : > { %s276_s2 = scalar_lea.hbm %s2354_s1, %s1416_s19  ;;  %p2182_p5 = pnand %p1524_p4, %p81_p1 }
  0x59   : > { %s269_s30 = scalar_lea.vmem [#allocation6], %s1368_s24  ;;  %s266_s6 = scalar_lea.sflag [#allocation7], %s265_s13 }
  0x5a   : > { %s277_s14 = sshll.u32 %s269_s30, 4  ;;  %p1752_p0 = pneg %p2182_p5  ;;  %s278_s14 = int_to_ptr.vmem [resolvable:$true] %s277_s14 }
  0x5b   : > { %s1763_s21 = scalar_lea.vmem %s278_s14, 256  ;;  %s1936_s5 = smov [#allocation6]  }
  0x5c   : > { %p1764_p11 = scmp.ne.s32.totalorder %s278_s14, %s1763_s21  ;;  %s1768_s15 = sshll.u32 %s1936_s5, 4  ;;  %s1769_s15 = int_to_ptr.vmem [resolvable:$false] %s1768_s15 }
  0x5d   : > { %s1770_s20 = scalar_lea.vmem %s1769_s15, 512  ;;  %p1771_p12 = scmp.lt.s32.totalorder %s278_s14, %s1769_s15 }
  0x5e   : > { %p1766_p8 = pnand %p1764_p11, %p1752_p0  ;;  %p1772_p4 = scmp.lt.s32.totalorder %s1770_s20, %s1763_s21 }
  0x60   : > { %p1767_p9 = pneg %p1766_p8  ;;  %p1773_p6 = por %p1772_p4, %p1771_p12 }
  0x62   : > { %p1774_p7 = pnand %p1773_p6, %p1767_p9 }
  0x64   : > { %1777 = shalt.err (!%p1774_p7)
}
  0x65   : > { %1518 = dma.hbm_to_vmem [thread:$0]  (!%p2182_p5), %s276_s2, 256, %s278_s14, %s266_s6, %s2409_s11, %s2409_s11, %s2408_s22  }
  0x66   : > { %289 = sbr.rel (%p2095_p13) target bundleno = 1142 (0x476), region = 44  ;;  %s291_s19 = sand.u32 (!%p2095_p13), 1, %s1906_s28  }
  0x67   : > { %s2196_s24 = sshll.u32 (!%p2095_p13), %s291_s19, 4  ;;  %s292_s27 = scalar_lea.sflag (!%p2095_p13), [#allocation4], %s291_s19 }
  0x68   : > { %s295_s3 = scalar_lea.vmem (!%p2095_p13), [#allocation3], %s2196_s24 }
  0x6b   : > { %1861 = dma.done.wait (%p2070_p3), %s292_s27, 256  }
  0x6c   : > { %1863 = vsyncadd (%p2070_p3), %s292_s27, 4294967040  ;;  %s2412_s4 = sld [smem:[#allocation18_spill]]  ;;  %s302_s11 = sand.u32 1, %s1894_s25  }
  0x6d   : > { %s2413_s30 = sld [smem:[#allocation20_spill]]  ;;  %s2205_s18 = sshll.u32 %s302_s11, 4 }
  0x6e   : > { %s304_s14 = scalar_lea.vmem [#allocation6], %s2205_s18 }
  0x72   : > { %s300_s22 = sand.u32 1, %s2412_s4  }
  0x73   : > { %s301_s2 = scalar_lea.sflag [#allocation7], %s300_s22  ;;  %p2414_p13 = scmp.ne.s32.totalorder %s2413_s30, 0 }
  0x75   : > { %1865 = dma.done.wait (%p2414_p13), %s301_s2, 256  }
  0x76   : > { %1867 = vsyncadd (%p2414_p13), %s301_s2, 4294967040  ;;  %p2415_p2 = scmp.eq.s32.totalorder %s2412_s4, 0 }
  0x78   : > { %1869 = dma.done.wait (%p2415_p2), [#allocation7], 2048   ;;  %p2416_p3 = pmov %p2415_p2 }
  0x79   : > { %s2417_s6 = sld [smem:[#allocation15_spill]] }
  0x7a   : > { %1871 = vsyncadd (%p2416_p3), [#allocation7], 4294965248  ;;  %s2418_s20 = sld [smem:[#allocation16_spill]] }
  0x7f   : > { %s339_s21 = sand.u32 1, %s2417_s6  }
  0x80   : > { %s1376_s5 = sshll.u32 %s339_s21, 4  ;;  %p1377_p10 = scmp.ne.s32.totalorder %s2418_s20, 0 }
  0x81   : > { %s2219_s15 = scalar_lea.vmem [#allocation9], %s1376_s5 }
  0x82   : > { %348 = sbr.rel (%p1377_p10) target bundleno = 137 (0x89), region = 60 }
  0x87   : > { %v1937_v0 = vmov 0.0  }
  0x88   : > { %349 = vst [vmem:[#allocation2] sm:$0xff] %v1937_v0  ;;  %350 = vst [vmem:[#allocation2 + $0x8] sm:$0xff] %v1937_v0 }
  0x89 PF: > { %v1664_v1 = vld [vmem:[%s304_s14] ss:$8 sps:$4 sm:$0xff]   ;;  %s1938_s13 = smov 112   ;;  %v1939_v3 = vmov 0.0   ;;  %vm1940_vm0 = vmmov 0   ;;  %s1941_s19 = smov 96  }
  0x8a   : > { %432 = vrot.lane.b32.xlu0 %v1664_v1, %s1938_s13  ;;  %363 = vxpose.xlu1.c.b16.start.end [1/1] (short) (narrow) %v1664_v1, 16  ;;  %v1668_v2 = vld [vmem:[%s295_s3] ss:$8 sps:$4 sm:$0xff]   ;;  %s1942_s27 = smov 80   ;;  %s1943_s4 = smov 64   ;;  %vm385_vm1 = vcmask 130048  }
  0x8b   : > { %1438 = vmatprep.subr.bf16.mxu0 %v1939_v3  ;;  %1440 = vmatprep.mubr.msk.bf16.mxu0 %vm1940_vm0, %v1939_v3  ;;  %s1944_s30 = smov 48   ;;  %s1945_s22 = smov 32   ;;  %v1666_v4 = vld [vmem:[%s295_s3 + $0x4] ss:$8 sps:$4 sm:$0xff]   ;;  %vm458_vm2 = vcmask 1039360   ;;  %vm530_vm3 = vcmask 1031168  }
  0x8c   : > { %1439 = vmatpush3.bf16.msra.mxu0 %v1668_v2  ;;  %1444 = vmatprep.subr.bf16.mxu1 %v1939_v3  ;;  %s1946_s11 = smov 16   ;;  %s1947_s2 = smov 127   ;;  %v1669_v18 = vld [vmem:[%s304_s14 + $0x4] ss:$8 sps:$4 sm:$0xff]   ;;  %vm602_vm4 = vcmask 965632   ;;  %vm674_vm5 = vcmask 957440  }
  0x8d   : > { %1450 = vmatprep.subr.bf16.mxu0 %v1939_v3  ;;  %1446 = vmatprep.mubr.msk.bf16.mxu1 %vm1940_vm0, %v1939_v3  ;;  %s1948_s6 = smov 126   ;;  %s1949_s5 = smov 118   ;;  %vm746_vm6 = vcmask 949248   ;;  %vm818_vm7 = vcmask 883712   ;;  %vm890_vm8 = vcmask 875520   ;;  %vm963_vm9 = vcmask 867328  }
  0x8e   : > { %507 = vrot.lane.b32.xlu0 %v1664_v1, %s1941_s19  ;;  %579 = vrot.lane.b32.xlu1 %v1664_v1, %s1942_s27  ;;  %s1950_s20 = smov 117   ;;  %s1951_s13 = smov 116  }
  0x8f   : > { %s1952_s19 = smov 108   ;;  %s1953_s24 = smov 107   ;;  %v355_v58 = vld [vmem:[#allocation2] sm:$0xff]  ;;  %v356_v0 = vld [vmem:[#allocation2 + $0x8] sm:$0xff] }
  0x90   : > { %s1954_s3 = smov 106   ;;  %s2419_s18 = sld [smem:[#allocation16_spill]] }
  0x92   : > { %651 = vrot.lane.b32.xlu1 %v1664_v1, %s1943_s4  ;;  %723 = vrot.lane.b32.xlu0 %v1664_v1, %s1944_s30 }
  0x96   : > { %795 = vrot.lane.b32.xlu1 %v1664_v1, %s1945_s22  ;;  %867 = vrot.lane.b32.xlu0 %v1664_v1, %s1946_s11  ;;  %p1391_p1 = scmp.ne.s32.totalorder %s2419_s18, 1 }
  0x97   : > { %s2420_s4 = sld [smem:[#allocation25_spill]] (!%p1391_p1) }
  0x9a   : > { %456 = vrot.lane.b32.xlu0 %v1666_v4, %s1947_s2  ;;  %454 = vrot.lane.b32.xlu1 %v1668_v2, %s1947_s2 }
  0x9e   : > { %528 = vrot.lane.b32.xlu0 %v1666_v4, %s1948_s6  ;;  %526 = vrot.lane.b32.xlu1 %v1668_v2, %s1948_s6  ;;  %s2421_s6 = sld [smem:[#allocation27_spill]] (!%p1391_p1) }
  0xa2   : > { %600 = vrot.lane.b32.xlu0 %v1666_v4, %s1949_s5  ;;  %598 = vrot.lane.b32.xlu1 %v1668_v2, %s1949_s5 }
  0xa6   : > { %672 = vrot.lane.b32.xlu0 %v1666_v4, %s1950_s20  ;;  %670 = vrot.lane.b32.xlu1 %v1668_v2, %s1950_s20 }
  0xaa   : > { %744 = vrot.lane.b32.xlu0 %v1666_v4, %s1951_s13  ;;  %742 = vrot.lane.b32.xlu1 %v1668_v2, %s1951_s13  ;;  %s2422_s13 = sld [smem:[#allocation26_spill]] (!%p1391_p1) }
  0xae   : > { %816 = vrot.lane.b32.xlu0 %v1666_v4, %s1952_s19  ;;  %814 = vrot.lane.b32.xlu1 %v1668_v2, %s1952_s19 }
  0xb2   : > { %886 = vrot.lane.b32.xlu0 %v1668_v2, %s1953_s24  ;;  %959 = vrot.lane.b32.xlu1 %v1668_v2, %s1954_s3 }
  0xb6   : > { %888 = vrot.lane.b32.xlu0 %v1666_v4, %s1953_s24  ;;  %961 = vrot.lane.b32.xlu1 %v1666_v4, %s1954_s3 }
  0xec   : > { %v371_v5 = vpop.trf.xlu1 }
  0xed   : > { %1441 = vmatmul.mubr.msk.bf16.vlgmr.msra.gmra.mxu0 %vm385_vm1, %v371_v5 }
  0xee   : > { %1452 = vmatprep.mubr.msk.bf16.mxu0 %vm1940_vm0, %v1939_v3 }
  0xfc   : > { %v433_v6 = vpop.permute.xlu0 %432 }
  0xfd   : > { %435 = vxpose.xlu0.c.b16.start.end [1/1] (short) (narrow) %v433_v6, 16 }
 0x100   : > { %v508_v7 = vpop.permute.xlu0 %507  ;;  %v580_v8 = vpop.permute.xlu1 %579 }
 0x101   : > { %510 = vxpose.xlu0.c.b16.start.end [1/1] (short) (narrow) %v508_v7, 16  ;;  %582 = vxpose.xlu1.c.b16.start.end [1/1] (short) (narrow) %v580_v8, 16 }
 0x104   : > { %v652_v9 = vpop.permute.xlu1 %651  ;;  %v724_v10 = vpop.permute.xlu0 %723 }
 0x105   : > { %654 = vxpose.xlu0.c.b16.start.end [1/1] (short) (narrow) %v652_v9, 16 }
 0x108   : > { %v796_v11 = vpop.permute.xlu1 %795  ;;  %v868_v12 = vpop.permute.xlu0 %867 }
 0x109   : > { %726 = vxpose.xlu0.c.b16.start.end [1/1] (short) (narrow) %v724_v10, 16 }
 0x10c   : > { %v457_v13 = vpop.permute.xlu0 %456  ;;  %v455_v14 = vpop.permute.xlu1 %454 }
 0x10d   : > { %798 = vxpose.xlu0.c.b16.start.end [1/1] (short) (narrow) %v796_v11, 16  ;;  %v459_v15 = vsel %vm458_vm2, %v455_v14, %v457_v13 }
 0x10e   : > { %1445 = vmatpush3.bf16.msra.mxu1 %v459_v15 }
 0x10f   : > { %1456 = vmatprep.subr.bf16.mxu1 %v1939_v3 }
 0x110   : > { %v529_v16 = vpop.permute.xlu0 %528  ;;  %v527_v17 = vpop.permute.xlu1 %526 }
 0x111   : > { %870 = vxpose.xlu0.c.b16.start.end [1/1] (short) (narrow) %v868_v12, 16  ;;  %v531_v19 = vsel %vm530_vm3, %v527_v17, %v529_v16 }
 0x112   : > { %1451 = vmatpush3.bf16.msra.mxu0 %v531_v19 }
 0x113   : > { %1462 = vmatprep.subr.bf16.mxu0 %v1939_v3 }
 0x114   : > { %v601_v20 = vpop.permute.xlu0 %600  ;;  %v599_v22 = vpop.permute.xlu1 %598 }
 0x115   : > { %943 = vxpose.xlu0.c.b16.start.end [1/1] (short) (narrow) %v1669_v18, 16  ;;  %v603_v32 = vsel %vm602_vm4, %v599_v22, %v601_v20 }
 0x118   : > { %v673_v21 = vpop.permute.xlu0 %672  ;;  %v671_v24 = vpop.permute.xlu1 %670 }
 0x119   : > { %v675_v35 = vsel %vm674_vm5, %v671_v24, %v673_v21 }
 0x11c   : > { %v745_v23 = vpop.permute.xlu0 %744  ;;  %v743_v26 = vpop.permute.xlu1 %742 }
 0x11d   : > { %v747_v38 = vsel %vm746_vm6, %v743_v26, %v745_v23 }
 0x120   : > { %v817_v25 = vpop.permute.xlu0 %816  ;;  %v815_v28 = vpop.permute.xlu1 %814 }
 0x121   : > { %v819_v40 = vsel %vm818_vm7, %v815_v28, %v817_v25 }
 0x124   : > { %v887_v27 = vpop.permute.xlu0 %886  ;;  %v960_v30 = vpop.permute.xlu1 %959 }
 0x128   : > { %v889_v29 = vpop.permute.xlu0 %888  ;;  %v962_v33 = vpop.permute.xlu1 %961 }
 0x129   : > { %v891_v42 = vsel %vm890_vm8, %v887_v27, %v889_v29  ;;  %v964_v44 = vsel %vm963_vm9, %v960_v30, %v962_v33 }
 0x15f   : > { %v443_v31 = vpop.trf.xlu0 }
 0x160   : > { %1447 = vmatmul.mubr.msk.bf16.vlgmr.msra.gmra.mxu1 %vm385_vm1, %v443_v31 }
 0x161   : > { %1457 = vmatpush3.bf16.msra.mxu1 %v603_v32  ;;  %1458 = vmatprep.mubr.msk.bf16.mxu1 %vm1940_vm0, %v1939_v3 }
 0x162   : > { %1468 = vmatprep.subr.bf16.mxu1 %v1939_v3 }
 0x163   : > { %v518_v34 = vpop.trf.xlu0  ;;  %v590_v36 = vpop.trf.xlu1 }
 0x164   : > { %1453 = vmatmul.mubr.msk.bf16.vlgmr.msra.gmra.mxu0 %vm385_vm1, %v518_v34 }
 0x165   : > { %1463 = vmatpush3.bf16.msra.mxu0 %v675_v35  ;;  %1464 = vmatprep.mubr.msk.bf16.mxu0 %vm1940_vm0, %v1939_v3 }
 0x166   : > { %1474 = vmatprep.subr.bf16.mxu0 %v1939_v3 }
 0x167   : > { %v662_v37 = vpop.trf.xlu0 }
 0x168   : > { %1459 = vmatmul.mubr.msk.bf16.vlgmr.msra.gmra.mxu1 %vm385_vm1, %v590_v36 }
 0x169   : > { %1469 = vmatpush3.bf16.msra.mxu1 %v747_v38  ;;  %1470 = vmatprep.mubr.msk.bf16.mxu1 %vm1940_vm0, %v1939_v3 }
 0x16a   : > { %1480 = vmatprep.subr.bf16.mxu1 %v1939_v3 }
 0x16b   : > { %v734_v39 = vpop.trf.xlu0 }
 0x16c   : > { %1465 = vmatmul.mubr.msk.bf16.vlgmr.msra.gmra.mxu0 %vm385_vm1, %v662_v37 }
 0x16d   : > { %1475 = vmatpush3.bf16.msra.mxu0 %v819_v40  ;;  %1476 = vmatprep.mubr.msk.bf16.mxu0 %vm1940_vm0, %v1939_v3 }
 0x16e   : > { %1486 = vmatprep.subr.bf16.mxu0 %v1939_v3 }
 0x16f   : > { %v806_v41 = vpop.trf.xlu0 }
 0x170   : > { %1471 = vmatmul.mubr.msk.bf16.vlgmr.msra.gmra.mxu1 %vm385_vm1, %v734_v39 }
 0x171   : > { %1481 = vmatpush3.bf16.msra.mxu1 %v891_v42  ;;  %1482 = vmatprep.mubr.msk.bf16.mxu1 %vm1940_vm0, %v1939_v3 }
 0x173   : > { %v878_v43 = vpop.trf.xlu0 }
 0x174   : > { %1477 = vmatmul.mubr.msk.bf16.vlgmr.msra.gmra.mxu0 %vm385_vm1, %v806_v41 }
 0x175   : > { %1487 = vmatpush3.bf16.msra.mxu0 %v964_v44  ;;  %1488 = vmatprep.mubr.msk.bf16.mxu0 %vm1940_vm0, %v1939_v3 }
 0x177   : > { %v951_v45 = vpop.trf.xlu0 }
 0x178   : > { %1483 = vmatmul.mubr.msk.bf16.vlgmr.msra.gmra.mxu1 %vm385_vm1, %v878_v43 }
 0x17c   : > { %1489 = vmatmul.mubr.msk.bf16.vlgmr.msra.gmra.mxu0 %vm385_vm1, %v951_v45 }
 0x1ad   : > { %v423_v46 = vpop.f32.mrf.mxu0 }
 0x1ae   : > { %v430_v63 = vadd.f32 %v423_v46, %v355_v58 }
 0x1af   : > { %v1442_v47 = vpop.f32.mrf.mxu0 }
 0x1b1   : > { %v426_v48 = vpop.f32.mrf.mxu0 }
 0x1b2   : > { %v431_v6 = vadd.f32 %v426_v48, %v356_v0 }
 0x1b3   : > { %v1443_v49 = vpop.f32.mrf.mxu0 }
 0x220   : > { %v498_v50 = vpop.f32.mrf.mxu1 }
 0x221   : > { %v505_v3 = vadd.f32 %v498_v50, %v430_v63 }
 0x222   : > { %v1448_v51 = vpop.f32.mrf.mxu1 }
 0x224   : > { %v501_v52 = vpop.f32.mrf.mxu1  ;;  %v570_v53 = vpop.f32.mrf.mxu0 }
 0x225   : > { %v577_v7 = vadd.f32 %v570_v53, %v505_v3  ;;  %v506_v10 = vadd.f32 %v501_v52, %v431_v6 }
 0x226   : > { %v1449_v54 = vpop.f32.mrf.mxu1  ;;  %v1454_v55 = vpop.f32.mrf.mxu0 }
 0x228   : > { %v573_v56 = vpop.f32.mrf.mxu0  ;;  %v642_v57 = vpop.f32.mrf.mxu1 }
 0x229   : > { %v649_v11 = vadd.f32 %v642_v57, %v577_v7  ;;  %v578_v14 = vadd.f32 %v573_v56, %v506_v10 }
 0x22a   : > { %v1455_v59 = vpop.f32.mrf.mxu0  ;;  %v1460_v60 = vpop.f32.mrf.mxu1 }
 0x22c   : > { %v645_v61 = vpop.f32.mrf.mxu1  ;;  %v714_v62 = vpop.f32.mrf.mxu0 }
 0x22d   : > { %v721_v15 = vadd.f32 %v714_v62, %v649_v11  ;;  %v650_v18 = vadd.f32 %v645_v61, %v578_v14 }
 0x22e   : > { %v1461_v1 = vpop.f32.mrf.mxu1  ;;  %v1466_v2 = vpop.f32.mrf.mxu0 }
 0x230   : > { %v717_v4 = vpop.f32.mrf.mxu0  ;;  %v786_v5 = vpop.f32.mrf.mxu1 }
 0x231   : > { %v793_v19 = vadd.f32 %v786_v5, %v721_v15  ;;  %v722_v22 = vadd.f32 %v717_v4, %v650_v18 }
 0x232   : > { %v1467_v8 = vpop.f32.mrf.mxu0  ;;  %v1472_v9 = vpop.f32.mrf.mxu1 }
 0x234   : > { %v789_v12 = vpop.f32.mrf.mxu1  ;;  %v858_v13 = vpop.f32.mrf.mxu0 }
 0x235   : > { %v865_v23 = vadd.f32 %v858_v13, %v793_v19  ;;  %v794_v26 = vadd.f32 %v789_v12, %v722_v22 }
 0x236   : > { %v1473_v16 = vpop.f32.mrf.mxu1  ;;  %v1478_v17 = vpop.f32.mrf.mxu0 }
 0x238   : > { %v861_v20 = vpop.f32.mrf.mxu0  ;;  %v930_v21 = vpop.f32.mrf.mxu1 }
 0x239   : > { %v937_v27 = vadd.f32 %v930_v21, %v865_v23  ;;  %v866_v30 = vadd.f32 %v861_v20, %v794_v26 }
 0x23a   : > { %v1479_v24 = vpop.f32.mrf.mxu0  ;;  %v1484_v25 = vpop.f32.mrf.mxu1 }
 0x23c   : > { %v933_v28 = vpop.f32.mrf.mxu1  ;;  %v1003_v29 = vpop.f32.mrf.mxu0 }
 0x23d   : > { %v1010_v31 = vadd.f32 %v1003_v29, %v937_v27  ;;  %v938_v34 = vadd.f32 %v933_v28, %v866_v30 }
 0x23e   : > { %v1485_v32 = vpop.f32.mrf.mxu1  ;;  %v1490_v33 = vpop.f32.mrf.mxu0 }
 0x23f   : > { %1012 = vst [vmem:[#allocation2] sm:$0xff] %v1010_v31  ;;  %1017 = sbr.rel (%p1391_p1) target bundleno = 1115 (0x45b), region = 64 }
 0x240   : > { %v1006_v35 = vpop.f32.mrf.mxu0 }
 0x241   : > { %v1011_v36 = vadd.f32 %v1006_v35, %v938_v34 }
 0x242   : > { %v1491_v37 = vpop.f32.mrf.mxu0 }
 0x243   : > { %1013 = vst [vmem:[#allocation2 + $0x8] sm:$0xff] %v1011_v36 }
 0x244   : > { %v1020_v38 = vld [vmem:[%s2420_s4] sm:$0xff]  ;;  %v1955_v39 = vmov 0   ;;  %v1021_v40 = vld [vmem:[%s2420_s4 + $0x8] sm:$0xff]  ;;  %v1956_v41 = vmov 0.0   ;;  %vm1957_vm10 = vmmov 0  }
 0x245   : > { %1670 = vset.pattern.permute.xlu0 %v1955_v39  ;;  %1671 = vset.pattern.permute.xlu1 %v1955_v39  ;;  %v1038_v42 = vld [vmem:[%s2421_s6] sm:$0xff]  ;;  %v1675_v45 = vld [vmem:[#allocation8 + $0x64] ss:$8 sps:$4 sm:$0xff]   ;;  %v1677_v46 = vld [vmem:[#allocation8 + $0x60] ss:$8 sps:$4 sm:$0xff]  }
 0x246   : > { %1024 = vperm.xlu0 %1670, %v1020_v38   ;;  %1216 = vmatprep.mubr.bf16.mxu1 %v1955_v39  ;;  %v1672_v43 = vld [vmem:[#allocation8 + $0x74] ss:$8 sps:$4 sm:$0xff]   ;;  %v1674_v44 = vld [vmem:[#allocation8 + $0x70] ss:$8 sps:$4 sm:$0xff]   ;;  %v1681_v49 = vld [vmem:[#allocation8 + $0x44] ss:$8 sps:$4 sm:$0xff]  }
 0x247   : > { %1492 = vmatprep.subr.bf16.mxu0 %v1956_v41  ;;  %1494 = vmatprep.mubr.msk.bf16.mxu0 %vm1957_vm10, %v1956_v41  ;;  %v1678_v47 = vld [vmem:[#allocation8 + $0x54] ss:$8 sps:$4 sm:$0xff]   ;;  %v1680_v48 = vld [vmem:[#allocation8 + $0x50] ss:$8 sps:$4 sm:$0xff]   ;;  %v1683_v50 = vld [vmem:[#allocation8 + $0x40] ss:$8 sps:$4 sm:$0xff]  }
 0x248   : > { %1041 = vperm.xlu1 %1671, %v1038_v42   ;;  %1184 = vmatprep.subr.bf16.mxu1 %v1672_v43  ;;  %v1684_v51 = vld [vmem:[#allocation8 + $0x34] ss:$8 sps:$4 sm:$0xff]   ;;  %v1686_v52 = vld [vmem:[#allocation8 + $0x30] ss:$8 sps:$4 sm:$0xff]   ;;  %v1687_v53 = vld [vmem:[#allocation8 + $0x24] ss:$8 sps:$4 sm:$0xff]  }
 0x249   : > { %1185 = vmatpush1.bf16.msra.mxu1 %v1674_v44  ;;  %v1689_v54 = vld [vmem:[#allocation8 + $0x20] ss:$8 sps:$4 sm:$0xff]   ;;  %v1690_v55 = vld [vmem:[#allocation8 + $0x14] ss:$8 sps:$4 sm:$0xff]   ;;  %v1692_v56 = vld [vmem:[#allocation8 + $0x10] ss:$8 sps:$4 sm:$0xff]  }
 0x24a   : > { %1029 = vperm.xlu0 %1670, %v1021_v40   ;;  %1186 = vmatprep.subr.bf16.mxu1 %v1675_v45  ;;  %v1018_v58 = vld [vmem:[#allocation2] sm:$0xff]  ;;  %v1019_v59 = vld [vmem:[#allocation2 + $0x8] sm:$0xff]  ;;  %v1693_v3 = vld [vmem:[#allocation8 + $0x4] ss:$8 sps:$4 sm:$0xff]  }
 0x24b   : > { %v1036_v2 = vld [vmem:[%s2422_s13] sm:$0xf]  ;;  %v1695_v4 = vld [vmem:[#allocation8] ss:$8 sps:$4 sm:$0xff]  }
 0x24d   : > { %1187 = vmatpush1.bf16.msra.mxu1 %v1677_v46 }
 0x24e   : > { %1188 = vmatprep.subr.bf16.mxu1 %v1678_v47 }
 0x251   : > { %1189 = vmatpush1.bf16.msra.mxu1 %v1680_v48 }
 0x252   : > { %1190 = vmatprep.subr.bf16.mxu1 %v1681_v49 }
 0x255   : > { %1191 = vmatpush1.bf16.msra.mxu1 %v1683_v50 }
 0x256   : > { %1192 = vmatprep.subr.bf16.mxu1 %v1684_v51 }
 0x259   : > { %1193 = vmatpush1.bf16.msra.mxu1 %v1686_v52 }
 0x25a   : > { %1194 = vmatprep.subr.bf16.mxu1 %v1687_v53 }
 0x25d   : > { %1195 = vmatpush1.bf16.msra.mxu1 %v1689_v54 }
 0x25e   : > { %1196 = vmatprep.subr.bf16.mxu1 %v1690_v55 }
 0x261   : > { %1197 = vmatpush1.bf16.msra.mxu1 %v1692_v56 }
 0x262   : > { %1198 = vmatprep.subr.bf16.mxu1 %v1693_v3 }
 0x265   : > { %1199 = vmatpush1.bf16.msra.mxu1 %v1695_v4 }
 0x2c1   : > { %v1025_v57 = vpop.permute.xlu0 %1024 }
 0x2c2   : > { %v1032_v60 = vadd.f32 %v1025_v57, %v1018_v58 }
 0x2c3   : > { %v1042_v5 = vpop.permute.xlu1 %1041 }
 0x2c4   : > { %v1034_v63 = vmax.f32 %v1032_v60, 0.0 }
 0x2c5   : > { %v1030_v61 = vpop.permute.xlu0 %1029 }
 0x2c6   : > { %v1033_v62 = vadd.f32 %v1030_v61, %v1019_v59 }
 0x2c8   : > { %v1035_v0 = vmax.f32 %v1033_v62, 0.0 }
 0x2ca   : > { %v1037_v1 = vpack.c.bf16 %v1035_v0, %v1034_v63 }
 0x2cc   : > { %1493 = vmatpush3.bf16.msra.mxu0 %v1037_v1 }
 0x2cf   : > { %1495 = vmatmul.mubr.msk.bf16.vlgmr.msra.gmra.mxu0 %vm385_vm1, %v1036_v2 }
 0x38f   : > { %v1081_v6 = vpop.f32.mrf.mxu0 }
 0x390   : > { %v1082_v7 = vadd.f32 %v1081_v6, %v1042_v5 }
 0x391   : > { %v1496_v8 = vpop.f32.mrf.mxu0 }
 0x392   : > { %v1087_v9 = vpack.c.bf16 %v1082_v7, %v1082_v7 }
 0x393   : > { %v1084_v10 = vpop.f32.mrf.mxu0 }
 0x394   : > { %1217 = vmatmul.mubr.bf16.vlgmr.msra.gmra.mxu1 %v1087_v9 }
 0x395   : > { %v1497_v11 = vpop.f32.mrf.mxu0 }
 0x454   : > { %v1218_v12 = vpop.f32.mrf.mxu1 }
 0x455   : > { %1225 = vst [vmem:[%s2219_s15] sm:$0xff] %v1218_v12 }
 0x456   : > { %v1220_v13 = vpop.f32.mrf.mxu1 }
 0x457   : > { %1226 = vst [vmem:[%s2219_s15 + $0x8] sm:$0xff] %v1220_v13 }
 0x458   : > { %v1222_v14 = vpop.f32.mrf.mxu1 }
 0x45a   : > { %v1223_v15 = vpop.f32.mrf.mxu1 }
 0x45b PF: > { %s2423_s19 = sld [smem:[#allocation17_spill]]  ;;  %s1242_s2 = sshll.u32 %s2219_s15, 4  ;;  %s1243_s2 = int_to_ptr.vmem [resolvable:$true] %s1242_s2 }
 0x45c   : > { %s2425_s3 = sld [smem:[#allocation21_spill]]  ;;  %s1228_s6 = scalar_lea.sflag [#allocation5], %s339_s21 }
 0x45d   : > { %s2426_s30 = sld [smem:[#allocation29_spill]]  ;;  %s1778_s5 = scalar_lea.vmem %s1243_s2, 256 }
 0x45e   : > { %p1779_p5 = scmp.ne.s32.totalorder %s1243_s2, %s1778_s5  ;;  %s1958_s20 = smov [#allocation9]  }
 0x45f   : > { %s1782_s13 = sshll.u32 %s1958_s20, 4  ;;  %s1783_s13 = int_to_ptr.vmem [resolvable:$false] %s1782_s13 }
 0x460   : > { %s1784_s0 = scalar_lea.vmem %s1783_s13, 512  ;;  %p1785_p9 = scmp.lt.s32.totalorder %s1243_s2, %s1783_s13 }
 0x461   : > { %s1417_s18 = sshll.u32 %s2423_s19, 8  ;;  %p1786_p12 = scmp.lt.s32.totalorder %s1784_s0, %s1778_s5 }
 0x462   : > { %p2428_p0 = scmp.ne.s32.totalorder %s2425_s3, 0 }
 0x463   : > { %s2427_s11 = smov %s2426_s30  ;;  %s1240_s22 = scalar_lea.hbm %s2426_s30, %s1417_s18 }
 0x464   : > { %p1780_p11 = pnand %p1779_p5, %p2428_p0  ;;  %p1787_p4 = por %p1786_p12, %p1785_p9 }
 0x466   : > { %p1781_p8 = pneg %p1780_p11 }
 0x468   : > { %p1788_p6 = pnand %p1787_p4, %p1781_p8 }
 0x46a   : > { %1791 = shalt.err (!%p1788_p6)
}
 0x46b   : > { %s1792_s19 = scalar_lea.hbm %s1240_s22, 256  ;;  %s1796_s24 = scalar_lea.hbm %s2427_s11, 512 }
 0x46c   : > { %p1793_p7 = scmp.ne.s32.totalorder %s1240_s22, %s1792_s19  ;;  %p1797_p3 = scmp.lt.s32.totalorder %s1240_s22, %s2427_s11 }
 0x46d   : > { %p1798_p10 = scmp.lt.s32.totalorder %s1796_s24, %s1792_s19 }
 0x46e   : > { %p1794_p13 = pnand %p1793_p7, %p2428_p0 }
 0x46f   : > { %p1799_p1 = por %p1798_p10, %p1797_p3 }
 0x470   : > { %p1795_p2 = pneg %p1794_p13 }
 0x472   : > { %p1800_p5 = pnand %p1799_p1, %p1795_p2 }
 0x474   : > { %1803 = shalt.err (!%p1800_p5)
}
 0x475   : > { %1506 = dma.vmem_to_hbm [thread:$0]  (%p2428_p0), %s1243_s2, 256, %s1240_s22, %s1228_s6  }
 0x476 PF: > { %s2429_s0 = sld [smem:[#allocation14_spill]]  ;;  %p1526_p11 = scmp.ge.s32.totalorder %s1930_s10, 2 }
 0x477   : > { %s2430_s27 = sld [smem:[#allocation22_spill]] }
 0x47c   : > { %s1254_s30 = sand.u32 1, %s2429_s0  }
 0x47d   : > { %p2431_p8 = scmp.ne.s32.totalorder %s2430_s27, 0  ;;  %s1255_s5 = scalar_lea.sflag [#allocation5], %s1254_s30 }
 0x47f   : > { %p1520_p9 = pnand %p1526_p11, %p2431_p8 }
 0x481   : > { %p1521_p12 = pneg %p1520_p9 }
 0x483   : > { %1873 = dma.done.wait (%p1521_p12), %s1255_s5, 256  }
 0x484   : > { %1875 = vsyncadd (%p1521_p12), %s1255_s5, 4294967040  ;;  %s25_s10 = sadd.s32 1, %s1930_s10   ;;  %s2433_s21 = sld [smem:[#allocation15_spill]] }
 0x485   : > { %p2306_p4 = scmp.ge.s32.totalorder %s25_s10, 6   ;;  %s2434_s3 = sld [smem:[#allocation23_spill]] }
 0x486   : > { %s2435_s22 = smov %s1886_s23  ;;  %s2436_s23 = smov %s2140_s16 }
 0x487   : > { %s2437_s24 = smov %s1894_s25  ;;  %s2438_s25 = smov %s1898_s26 }
 0x488   : > { %s2439_s26 = smov %s2171_s12  ;;  %s2440_s27 = smov %s1906_s28 }
 0x489   : > { %s2441_s28 = smov %s1910_s29  ;;  %s2442_s29 = smov %s2143_s7 }
 0x48a   : > { %s2443_s30 = smov %s1922_s8  ;;  %s2444_s7 = smov %s1926_s9 }
 0x48b   : > { %s2445_s8 = smov %s2434_s3  ;;  %s2446_s9 = smov %s2452_s17 }
 0x48c   :  { %24 = sbr.rel (!%p2306_p4) target bundleno = 19 (0x13), region = 114 }
 0x491   :  { %1260 = vsyncpa [#allocation4], 1 }
 0x492   :  { %1262 = vsyncpa [#allocation4 + $0x1], 1 }
 0x493   :  { %1263 = vsyncpa [#allocation7], 1 }
 0x494   :  { %1265 = vsyncpa [#allocation7 + $0x1], 1 }
 0x495   :  { %1266 = vsyncpa [#allocation5], 1 }
 0x496   :  { %1268 = vsyncpa [#allocation5 + $0x1], 1 }

</bundles_post_ra>
